<compile_context>
chip_gen: v7x
topology: tpu7x:2x2x1
jax: 0.10.0
libtpu: 0.0.40
codegen_flags: <defaults>
</compile_context>

<pallas_src>
import numpy as np
import jax
import jax.numpy as jnp
from jax.experimental import pallas as pl
from jax.experimental.pallas import tpu as pltpu


def _se_kernel(x_ref, w1t_ref, w2t_ref, o_ref):
    # x_ref: (Bt, C, HW) in the caller's dtype; weights are VMEM-resident f32.
    x = x_ref[...]
    xf = x.astype(jnp.float32)                       # accumulate in f32

    # Squeeze: global average pool over the lane (HW) axis -> (Bt, C).
    gap = jnp.mean(xf, axis=-1)

    # Excitation: batched bias-free 1x1-conv matmuls on the MXU.
    h = jnp.dot(gap, w1t_ref[...], preferred_element_type=jnp.float32)   # (Bt, Cr)
    h = jnp.maximum(h, 0.0)                                              # relu
    s = jnp.dot(h, w2t_ref[...], preferred_element_type=jnp.float32)     # (Bt, C)
    s = jax.nn.sigmoid(s)                                                # sigmoid

    # Scale: per-(batch, channel) gate broadcast along lanes; lane-dense store
    # back in the input dtype.
    o_ref[...] = (xf * s[:, :, None]).astype(o_ref.dtype)


def se_forward(x_nchw, w1, w2):
    """x_nchw: (B, C, H, W); w1: (C//ratio, C); w2: (C, C//ratio)."""
    B, C, H, W = x_nchw.shape
    HW = H * W
    Cr = w1.shape[0]

    # Pure reshape of contiguous NCHW -> (B, C, HW); keep native dtype so the
    # kernel DMAs exactly the input bytes (no extra HBM round trip for a cast).
    x = x_nchw.reshape(B, C, HW)
    itemsize = jnp.dtype(x.dtype).itemsize

    # Pre-transpose the tiny weights (free in the wrapper) so the kernel does
    # plain row-major matmuls with no in-kernel transpose.
    w1t = jnp.transpose(w1).astype(jnp.float32)      # (C, Cr)
    w2t = jnp.transpose(w2).astype(jnp.float32)      # (Cr, C)

    # --- Block sizing: HBM-bandwidth bound, so pick the largest batch-packed
    # block that hits the ~2-4 MiB amortization sweet spot and stays within a
    # v7x-safe pipelined VMEM footprint (4 buffers of the block + weights).
    row_bytes = C * HW * itemsize
    target_block_bytes = 4 * 1024 * 1024
    Bt = int(max(1, min(B, target_block_bytes // max(row_bytes, 1))))
    # v7x has 2 TCs: keep several grid steps per core for DMA/compute overlap,
    # but only when that does not shrink blocks below the amortization size.
    if B // Bt < 8 and (B // 8) * row_bytes >= 2 * 1024 * 1024:
        Bt = max(1, B // 8)
    grid = (pl.cdiv(B, Bt),)

    block_bytes = Bt * row_bytes
    weight_bytes = 2 * C * Cr * 4
    # in + out double-buffered blocks, weights, plus headroom; clamp to a
    # v7x-safe ceiling (64 MiB physical VMEM there).
    vmem_limit = int(min(max(4 * block_bytes + weight_bytes + (1 << 20),
                             16 * 1024 * 1024),
                         48 * 1024 * 1024))

    flops = 2 * B * C * HW + 4 * B * C * Cr          # GAP + gating + two FCs
    transcendentals = 2 * B * C                      # sigmoid ~2/element
    bytes_accessed = 2 * B * C * HW * itemsize + weight_bytes

    out = pl.pallas_call(
        _se_kernel,
        out_shape=jax.ShapeDtypeStruct((B, C, HW), x.dtype),
        grid_spec=pltpu.PrefetchScalarGridSpec(
            num_scalar_prefetch=0,
            grid=grid,
            in_specs=[
                pl.BlockSpec((Bt, C, HW), lambda b: (b, 0, 0)),   # batch-packed block
                pl.BlockSpec((C, Cr), lambda b: (0, 0)),          # resident weight
                pl.BlockSpec((Cr, C), lambda b: (0, 0)),          # resident weight
            ],
            out_specs=pl.BlockSpec((Bt, C, HW), lambda b: (b, 0, 0)),
        ),
        compiler_params=pltpu.CompilerParams(
            dimension_semantics=("parallel",),                    # megacore on v7x
            vmem_limit_bytes=vmem_limit),
        cost_estimate=pl.CostEstimate(
            flops=flops, transcendentals=transcendentals,
            bytes_accessed=bytes_accessed),
    )(x, w1t, w2t)

    return out.reshape(B, C, H, W)


def se_reference(x_nchw, w1, w2):
    """Pure-JAX reference for validation."""
    xf = x_nchw.astype(jnp.float32)
    gap = jnp.mean(xf, axis=(2, 3))                 # (B, C)
    h = jnp.maximum(gap @ w1.T, 0.0)                # (B, Cr)
    s = jax.nn.sigmoid(h @ w2.T)                    # (B, C)
    return (xf * s[:, :, None, None]).astype(x_nchw.dtype)


if __name__ == "__main__":
    B, C, H, W = 2, 32, 16, 16       # NCHW; ratio=4 -> C//ratio = 8
    ratio = 4
    Cr = C // ratio

    key = jax.random.PRNGKey(0)
    kx, k1, k2 = jax.random.split(key, 3)
    x = jax.random.normal(kx, (B, C, H, W), dtype=jnp.float32)
    w1 = (jax.random.normal(k1, (Cr, C)) * 0.2).astype(jnp.float32)  # squeeze conv
    w2 = (jax.random.normal(k2, (C, Cr)) * 0.2).astype(jnp.float32)  # excite conv

    out = jax.block_until_ready(se_forward(x, w1, w2))
    ref = jax.block_until_ready(se_reference(x, w1, w2))
    np.testing.assert_allclose(np.asarray(out), np.asarray(ref),
                               rtol=1e-4, atol=1e-5)

    print("KERNEL_OK")
</pallas_src>

<mosaic_0001>
module attributes {stable_mosaic.version = 11 : i64} {
  func.func @_se_kernel(%arg0: i32, %arg1: memref<2x32x256xf32, #tpu.memory_space<vmem>>, %arg2: memref<32x8xf32, #tpu.memory_space<vmem>>, %arg3: memref<8x32xf32, #tpu.memory_space<vmem>>, %arg4: memref<2x32x256xf32, #tpu.memory_space<vmem>>) attributes {dimension_semantics = [#tpu.dimension_semantics<parallel>], iteration_bounds = array<i64: 1>, scalar_prefetch = 0 : i64, scratch_operands = 0 : i64, tpu.core_type = #tpu.core_type<tc>, window_params = [{transform_indices = @transform_0, window_bounds = array<i64: 2, 32, 256>}, {pipeline_mode = #tpu.pipeline_mode<synchronous>, transform_indices = @transform_1, window_bounds = array<i64: 32, 8>}, {pipeline_mode = #tpu.pipeline_mode<synchronous>, transform_indices = @transform_2, window_bounds = array<i64: 8, 32>}, {transform_indices = @transform_3, window_bounds = array<i64: 2, 32, 256>}]} {
    %c0 = arith.constant 0 : index
    %c0_0 = arith.constant 0 : index
    %c0_1 = arith.constant 0 : index
    %0 = vector.load %arg1[%c0, %c0_0, %c0_1] : memref<2x32x256xf32, #tpu.memory_space<vmem>>, vector<2x32x256xf32>
    %cst = arith.constant dense<0.000000e+00> : vector<2x32xf32>
    %1 = vector.multi_reduction <add>, %0, %cst [2] : vector<2x32x256xf32> to vector<2x32xf32>
    %cst_2 = arith.constant 2.560000e+02 : f32
    %2 = vector.broadcast %cst_2 : f32 to vector<2x32xf32>
    %3 = arith.divf %1, %2 : vector<2x32xf32>
    %c0_3 = arith.constant 0 : index
    %c0_4 = arith.constant 0 : index
    %4 = vector.load %arg2[%c0_3, %c0_4] : memref<32x8xf32, #tpu.memory_space<vmem>>, vector<32x8xf32>
    %cst_5 = arith.constant dense<0.000000e+00> : vector<2x8xf32>
    %5 = tpu.matmul %3, %4, %cst_5 {dimension_numbers = #tpu.dot_dimension_numbers<[1], [0], [0], [1], [0, 0, 1, 1], [], []>} : vector<2x32xf32>, vector<32x8xf32>, vector<2x8xf32> -> vector<2x8xf32>
    %cst_6 = arith.constant 0.000000e+00 : f32
    %6 = vector.broadcast %cst_6 : f32 to vector<2x8xf32>
    %7 = arith.maximumf %5, %6 : vector<2x8xf32>
    %c0_7 = arith.constant 0 : index
    %c0_8 = arith.constant 0 : index
    %8 = vector.load %arg3[%c0_7, %c0_8] : memref<8x32xf32, #tpu.memory_space<vmem>>, vector<8x32xf32>
    %cst_9 = arith.constant dense<0.000000e+00> : vector<2x32xf32>
    %9 = tpu.matmul %7, %8, %cst_9 {dimension_numbers = #tpu.dot_dimension_numbers<[1], [0], [0], [1], [0, 0, 1, 1], [], []>} : vector<2x8xf32>, vector<8x32xf32>, vector<2x32xf32> -> vector<2x32xf32>
    %10 = arith.negf %9 : vector<2x32xf32>
    %11 = math.exp %10 : vector<2x32xf32>
    %cst_10 = arith.constant 1.000000e+00 : f32
    %12 = vector.broadcast %cst_10 : f32 to vector<2x32xf32>
    %13 = arith.addf %12, %11 : vector<2x32xf32>
    %14 = arith.divf %12, %13 : vector<2x32xf32>
    %15 = vector.shape_cast %14 : vector<2x32xf32> to vector<2x32x1xf32>
    %16 = vector.broadcast %15 : vector<2x32x1xf32> to vector<2x32x256xf32>
    %17 = arith.mulf %0, %16 : vector<2x32x256xf32>
    %c0_11 = arith.constant 0 : index
    %c0_12 = arith.constant 0 : index
    %c0_13 = arith.constant 0 : index
    %18 = vector.load %arg4[%c0_11, %c0_12, %c0_13] : memref<2x32x256xf32, #tpu.memory_space<vmem>>, vector<2x32x256xf32>
    tpu.vector_store %arg4[%c0_11, %c0_12, %c0_13], %17 {strides = array<i32>} : memref<2x32x256xf32, #tpu.memory_space<vmem>>, vector<2x32x256xf32>,
    return
  }
  func.func @transform_0(%arg0: i32) -> (i32, i32, i32) {
    %c0_i32 = arith.constant 0 : i32
    %c0_i32_0 = arith.constant 0 : i32
    %c0_i32_1 = arith.constant 0 : i32
    return %arg0, %c0_i32, %c0_i32_0 : i32, i32, i32
  }
  func.func @transform_1(%arg0: i32) -> (i32, i32) {
    %c0_i32 = arith.constant 0 : i32
    %c0_i32_0 = arith.constant 0 : i32
    %c0_i32_1 = arith.constant 0 : i32
    return %c0_i32, %c0_i32_0 : i32, i32
  }
  func.func @transform_2(%arg0: i32) -> (i32, i32) {
    %c0_i32 = arith.constant 0 : i32
    %c0_i32_0 = arith.constant 0 : i32
    %c0_i32_1 = arith.constant 0 : i32
    return %c0_i32, %c0_i32_0 : i32, i32
  }
  func.func @transform_3(%arg0: i32) -> (i32, i32, i32) {
    %c0_i32 = arith.constant 0 : i32
    %c0_i32_0 = arith.constant 0 : i32
    %c0_i32_1 = arith.constant 0 : i32
    return %arg0, %c0_i32, %c0_i32_0 : i32, i32, i32
  }
}

</mosaic_0001>

<bundles_post_ra>
// kernel: tpu_custom_call.1
= control target key start
LH: loop header
LB: loop body
LE: loop exit
PB: predicated region body
PF: predicated region fallthrough
CT: control target
= control target key end

     0   :  { %8 = vsyncpa [#allocation3], 0  ;;  %s607_s0 = inlined_call_operand.hbm [shape: f32[2,32,256], index: 0, kind: input, shape index: {}]   ;;  %s608_s1 = inlined_call_operand.vmem [shape: f32[32,8], index: 1, kind: input, shape index: {}]   ;;  %s609_s2 = inlined_call_operand.vmem [shape: f32[8,32], index: 2, kind: input, shape index: {}]   ;;  %s610_s3 = inlined_call_operand.hbm [shape: f32[2,32,256], index: 3, kind: output, shape index: {}]  }
   0x1   :  { %9 = vsyncpa [#allocation4], 0  ;;  %s471_s12 = smov [#allocation2]   ;;  %s423_s16 = scalar_lea.hbm %s607_s0, 2048 }
   0x2   :  { %s15_s13 = sshll.u32 %s471_s12, 4  ;;  %p424_p0 = scmp.ne.s32.totalorder %s607_s0, %s423_s16  ;;  %s16_s13 = int_to_ptr.vmem [resolvable:$true] %s15_s13 }
   0x3   :  { %p427_p1 = scmp.lt.u32.totalorder %s423_s16, %s607_s0 }
   0x5   :  { %p429_p2 = pnand %p427_p1, %p424_p0 }
   0x7   :  { %432 = shalt.err (!%p429_p2)
}
   0x8   :  { %s433_s21 = scalar_lea.vmem %s16_s13, 2048  ;;  %p438_p4 = scmp.lt.s32.totalorder %s16_s13, %s16_s13 }
   0x9   :  { %p434_p3 = scmp.ne.s32.totalorder %s16_s13, %s433_s21  ;;  %p439_p5 = scmp.lt.s32.totalorder %s433_s21, %s433_s21 }
   0xb   :  { %p440_p6 = por %p439_p5, %p438_p4 }
   0xd   :  { %p441_p7 = pnand %p440_p6, %p434_p3 }
   0xf   :  { %444 = shalt.err (!%p441_p7)
}
  0x10   :  { %s472_s22 = smov 256   ;;  %s473_s23 = smov 16  }
  0x11   :  { %21 = dma.hbm_to_vmem [thread:$0]  %s607_s0, 2048, %s16_s13, [#allocation3], %s472_s22, %s472_s22, %s473_s23  }
  0x12   :  { %467 = dma.done.wait [#allocation3], 2048  }
  0x13   :  { %468 = vsyncadd [#allocation3], 4294965248  ;;  %v513_v0 = vld [vmem:[#allocation2 + $0x40] sm:$0xff]  ;;  %v515_v1 = vld [vmem:[#allocation2 + $0x48] sm:$0xff]  ;;  %v474_v27 = vmov 0.0|0.0   ;;  %vm475_vm0 = vmmov 0   ;;  %v90_v32 = vlaneseq }
  0x14   :  { %v517_v2 = vld [vmem:[#allocation2] sm:$0xff]  ;;  %v57_v3 = vadd.f32 %v515_v1, %v513_v0  ;;  %v521_v4 = vld [vmem:[#allocation2 + $0x8] sm:$0xff]  ;;  %v523_v5 = vld [vmem:[#allocation2 + $0x50] sm:$0xff]  ;;  %406 = vmatprep.subr.bf16.mxu0 %v474_v27  ;;  %v476_v31 = vmov 0.0   ;;  %vm101_vm1 = vcmask 130112   ;;  %vm108_vm2 = vcmask 195712  }
  0x15   :  { %v525_v6 = vld [vmem:[#allocation2 + $0x58] sm:$0xff]  ;;  %v45_v7 = vadd.f32 %v521_v4, %v517_v2  ;;  %v529_v8 = vld [vmem:[#allocation2 + $0x10] sm:$0xff]  ;;  %v537_v12 = vld [vmem:[#allocation2 + $0x60] sm:$0xff]  ;;  %398 = vmatprep.mubr.msk.f32.mxu0 %vm475_vm0, %v476_v31  ;;  %401 = vmatprep.subr.mxu1 %v476_v31  ;;  %v91_v34 = vand.u32 127, %v90_v32  ;;  %v93_v39 = vshrl.u32 %v90_v32, 7  ;;  %vm115_vm3 = vcmask 261312  }
  0x16   :  { %v531_v9 = vld [vmem:[#allocation2 + $0x18] sm:$0xff]  ;;  %58 = vadd.xlane.f32.xlu1 %v57_v3  ;;  %v60_v10 = vadd.f32 %v525_v6, %v523_v5  ;;  %v539_v13 = vld [vmem:[#allocation2 + $0x68] sm:$0xff]  ;;  %v541_v14 = vld [vmem:[#allocation2 + $0x20] sm:$0xff]  ;;  %403 = vmatprep.mubr.msk.f32.mxu1 %vm475_vm0, %v476_v31  ;;  %vm136_vm4 = vcmask 1041409   ;;  %vm138_vm5 = vcmask 261120   ;;  %vm213_vm6 = vcmask 64512  }
  0x17   :  { %46 = vadd.xlane.f32.xlu0 %v45_v7  ;;  %v48_v11 = vadd.f32 %v531_v9, %v529_v8  ;;  %v543_v15 = vld [vmem:[#allocation2 + $0x28] sm:$0xff]  ;;  %v63_v16 = vadd.f32 %v539_v13, %v537_v12  ;;  %v549_v18 = vld [vmem:[#allocation2 + $0x70] sm:$0xff]  ;;  %v551_v19 = vld [vmem:[#allocation2 + $0x78] sm:$0xff]  ;;  %v96_v36 = vadd.s32 4294967288, %v91_v34  ;;  %v103_v38 = vadd.s32 4294967280, %v91_v34 }
  0x18   :  { %v51_v17 = vadd.f32 %v543_v15, %v541_v14  ;;  %v553_v20 = vld [vmem:[#allocation2 + $0x30] sm:$0xff]  ;;  %v555_v21 = vld [vmem:[#allocation2 + $0x38] sm:$0xff]  ;;  %v66_v22 = vadd.f32 %v551_v19, %v549_v18  ;;  %v78_v24 = vld [vmem:[%s608_s1] sm:$0xff]  ;;  %v110_v43 = vadd.s32 4294967272, %v91_v34  ;;  %v94_v47 = vsub.s32 %v91_v34, %v93_v39 }
  0x19   :  { %v54_v23 = vadd.f32 %v555_v21, %v553_v20  ;;  %v79_v25 = vld [vmem:[%s608_s1 + $0x8] sm:$0xff]  ;;  %v80_v28 = vld [vmem:[%s608_s1 + $0x10] sm:$0xff]  ;;  %v81_v29 = vld [vmem:[%s608_s1 + $0x18] sm:$0xff]  ;;  %v99_v41 = vsub.s32 %v96_v36, %v93_v39  ;;  %v106_v45 = vsub.s32 %v103_v38, %v93_v39  ;;  %v295_v34 = vsub.s32 0, %v93_v39 }
  0x1a   :  { %61 = vadd.xlane.f32.xlu1 %v60_v10  ;;  %v407_v26 = vpack.c.bf16 %v79_v25, %v78_v24  ;;  %v410_v30 = vpack.c.bf16 %v81_v29, %v80_v28  ;;  %v113_v54 = vsub.s32 %v110_v43, %v93_v39  ;;  %v212_v25 = vld [vmem:[%s609_s2] sm:$0xff]  ;;  %s477_s2 = smov [#allocation5]  }
  0x1b   :  { %49 = vadd.xlane.f32.xlu0 %v48_v11  ;;  %402 = vmatpush3.msra.mxu1 %v212_v25  ;;  %s368_s7 = sshll.u32 %s477_s2, 4  ;;  %s369_s7 = int_to_ptr.vmem [resolvable:$true] %s368_s7 }
  0x1c   :  { %408 = vmatpush3.bf16.msra.mxu0 %v407_v26  ;;  %s445_s8 = scalar_lea.vmem %s369_s7, 2048  ;;  %p450_p9 = scmp.lt.s32.totalorder %s369_s7, %s369_s7 }
  0x1d   :  { %409 = vmatprep.subr.bf16.mxu0 %v474_v27  ;;  %p446_p8 = scmp.ne.s32.totalorder %s369_s7, %s445_s8  ;;  %p451_p10 = scmp.lt.s32.totalorder %s445_s8, %s445_s8 }
  0x1e   :  { %64 = vadd.xlane.f32.xlu1 %v63_v16 }
  0x1f   :  { %52 = vadd.xlane.f32.xlu0 %v51_v17  ;;  %p452_p11 = por %p451_p10, %p450_p9 }
  0x20   :  { %411 = vmatpush3.bf16.msra.mxu0 %v410_v30 }
  0x21   :  { %p453_p12 = pnand %p452_p11, %p446_p8 }
  0x22   :  { %67 = vadd.xlane.f32.xlu1 %v66_v22 }
  0x23   :  { %55 = vadd.xlane.f32.xlu0 %v54_v23 }
  0xa3   :  { %v59_v33 = vpop.xlane.xlu1 %58 }
  0xa4   :  { %v47_v35 = vpop.xlane.xlu0 %46  ;;  %v74_v48 = vmul.f32 0.00390625, %v59_v33 }
  0xa5   :  { %v70_v51 = vmul.f32 0.00390625, %v47_v35 }
  0xa6   :  { %v120_v58 = vrot.slane %v74_v48, %v94_v47 }
  0xa7   :  { %v62_v37 = vpop.xlane.xlu1 %61  ;;  %v95_v62 = vrot.slane %v70_v51, %v94_v47 }
  0xa8   :  { %v50_v40 = vpop.xlane.xlu0 %49  ;;  %v75_v42 = vmul.f32 0.00390625, %v62_v37  ;;  %v314_v37 = vsub.s32 1, %v93_v39 }
  0xa9   :  { %v71_v44 = vmul.f32 0.00390625, %v50_v40 }
  0xaa   :  { %v124_v53 = vrot.slane %v75_v42, %v99_v41 }
  0xab   :  { %v65_v46 = vpop.xlane.xlu1 %64  ;;  %v100_v55 = vrot.slane %v71_v44, %v99_v41 }
  0xac   :  { %v76_v49 = vmul.f32 0.00390625, %v65_v46  ;;  %v53_v50 = vpop.xlane.xlu0 %52  ;;  %v125_v3 = vsel %vm101_vm1, %v124_v53, %v120_v58 }
  0xad   :  { %v72_v52 = vmul.f32 0.00390625, %v53_v50  ;;  %v102_v10 = vsel %vm101_vm1, %v100_v55, %v95_v62 }
  0xae   :  { %v129_v56 = vrot.slane %v76_v49, %v106_v45 }
  0xaf   :  { %v68_v57 = vpop.xlane.xlu1 %67  ;;  %v107_v59 = vrot.slane %v72_v52, %v106_v45 }
  0xb0   :  { %v77_v60 = vmul.f32 0.00390625, %v68_v57  ;;  %v56_v61 = vpop.xlane.xlu0 %55  ;;  %v130_v11 = vsel %vm108_vm2, %v129_v56, %v125_v3 }
  0xb1   :  { %v73_v63 = vmul.f32 0.00390625, %v56_v61  ;;  %v109_v17 = vsel %vm108_vm2, %v107_v59, %v102_v10 }
  0xb2   :  { %v134_v7 = vrot.slane %v77_v60, %v113_v54 }
  0xb3   :  { %v114_v16 = vrot.slane %v73_v63, %v113_v54 }
  0xb4   :  { %v135_v22 = vsel %vm115_vm3, %v134_v7, %v130_v11 }
  0xb5   :  { %v116_v23 = vsel %vm115_vm3, %v114_v16, %v109_v17 }
  0xb6   :  { %v137_v24 = vsel %vm136_vm4, %v135_v22, %v116_v23 }
  0xb7   :  { %399 = vmatmul.mubr.msk.f32.vlgmr.msra.gmra.mrb[0].mxu0 %vm138_vm5, %v137_v24 }
 0x18a   :  { %v207_v26 = vpop.f32.mrb[0].mxu0 }
 0x18b   :  { %v211_v27 = vmax.f32 %v207_v26, 0.0  ;;  %v400_v28 = vpop.f32.mrb[1].mxu0 }
 0x18d   :  { %404 = vmatmul.mubr.msk.f32.vlgmr.msra.gmra.mrb[0].mxu1 %vm213_vm6, %v211_v27 }
 0x260   :  { %v283_v29 = vpop.f32.mrb[0].mxu1 }
 0x261   :  { %v382_v30 = vmul.f32 -1.442695, %v283_v29  ;;  %v405_v31 = vpop.f32.mrb[1].mxu1 }
 0x263   :  { %419 = vpow2.f32 %v382_v30 }
 0x26d   :  { %v420_v32 = vpop.eup %419 }
 0x26e   :  { %v290_v33 = vadd.f32 1.0, %v420_v32 }
 0x270   :  { %421 = vrcp.f32 %v290_v33 }
 0x27a   :  { %v422_v35 = vpop.eup %421 }
 0x27b   :  { %v296_v36 = vrot.slane %v422_v35, %v295_v34  ;;  %v315_v38 = vrot.slane %v422_v35, %v314_v37 }
 0x27d   :  { %302 = vbcast.lane.b32.xlu1 %v296_v36, 264  ;;  %298 = vbcast.lane.b32.xlu0 %v296_v36, 256 }
 0x281   :  { %306 = vbcast.lane.b32.xlu1 %v296_v36, 272  ;;  %317 = vbcast.lane.b32.xlu0 %v315_v38, 256 }
 0x285   :  { %310 = vbcast.lane.b32.xlu1 %v296_v36, 280  ;;  %325 = vbcast.lane.b32.xlu0 %v315_v38, 272 }
 0x289   :  { %321 = vbcast.lane.b32.xlu1 %v315_v38, 264 }
 0x28d   :  { %329 = vbcast.lane.b32.xlu1 %v315_v38, 280 }
 0x2ef   :  { %v303_v40 = vpop.permute.xlu1 %302  ;;  %v299_v41 = vpop.permute.xlu0 %298 }
 0x2f0   :  { %v333_v42 = vmul.f32 %v303_v40, %v529_v8  ;;  %v334_v43 = vmul.f32 %v303_v40, %v531_v9  ;;  %v331_v44 = vmul.f32 %v299_v41, %v517_v2  ;;  %v332_v45 = vmul.f32 %v299_v41, %v521_v4 }
 0x2f2   :  { %349 = vst [vmem:[#allocation5 + $0x10] sm:$0xff] %v333_v42  ;;  %350 = vst [vmem:[#allocation5 + $0x18] sm:$0xff] %v334_v43 }
 0x2f3   :  { %347 = vst [vmem:[#allocation5] sm:$0xff] %v331_v44  ;;  %348 = vst [vmem:[#allocation5 + $0x8] sm:$0xff] %v332_v45  ;;  %v307_v39 = vpop.permute.xlu1 %306  ;;  %v318_v46 = vpop.permute.xlu0 %317 }
 0x2f4   :  { %v335_v47 = vmul.f32 %v307_v39, %v541_v14  ;;  %v336_v48 = vmul.f32 %v307_v39, %v543_v15  ;;  %v339_v49 = vmul.f32 %v318_v46, %v513_v0  ;;  %v340_v8 = vmul.f32 %v318_v46, %v515_v1 }
 0x2f6   :  { %351 = vst [vmem:[#allocation5 + $0x20] sm:$0xff] %v335_v47  ;;  %352 = vst [vmem:[#allocation5 + $0x28] sm:$0xff] %v336_v48 }
 0x2f7   :  { %355 = vst [vmem:[#allocation5 + $0x40] sm:$0xff] %v339_v49  ;;  %356 = vst [vmem:[#allocation5 + $0x48] sm:$0xff] %v340_v8  ;;  %v311_v2 = vpop.permute.xlu1 %310  ;;  %v326_v4 = vpop.permute.xlu0 %325 }
 0x2f8   :  { %v337_v9 = vmul.f32 %v311_v2, %v553_v20  ;;  %v338_v50 = vmul.f32 %v311_v2, %v555_v21  ;;  %v343_v51 = vmul.f32 %v326_v4, %v537_v12  ;;  %v344_v14 = vmul.f32 %v326_v4, %v539_v13 }
 0x2fa   :  { %353 = vst [vmem:[#allocation5 + $0x30] sm:$0xff] %v337_v9  ;;  %354 = vst [vmem:[#allocation5 + $0x38] sm:$0xff] %v338_v50 }
 0x2fb   :  { %359 = vst [vmem:[#allocation5 + $0x60] sm:$0xff] %v343_v51  ;;  %360 = vst [vmem:[#allocation5 + $0x68] sm:$0xff] %v344_v14  ;;  %v322_v0 = vpop.permute.xlu1 %321 }
 0x2fc   :  { %v341_v1 = vmul.f32 %v322_v0, %v523_v5  ;;  %v342_v15 = vmul.f32 %v322_v0, %v525_v6 }
 0x2fe   :  { %357 = vst [vmem:[#allocation5 + $0x50] sm:$0xff] %v341_v1  ;;  %358 = vst [vmem:[#allocation5 + $0x58] sm:$0xff] %v342_v15 }
 0x2ff   :  { %v330_v20 = vpop.permute.xlu1 %329 }
 0x300   :  { %v345_v21 = vmul.f32 %v330_v20, %v549_v18  ;;  %v346_v12 = vmul.f32 %v330_v20, %v551_v19 }
 0x302   :  { %361 = vst [vmem:[#allocation5 + $0x70] sm:$0xff] %v345_v21  ;;  %362 = vst [vmem:[#allocation5 + $0x78] sm:$0xff] %v346_v12 }
 0x303   :  { %456 = shalt.err (!%p453_p12)
}
 0x304   :  { %s457_s11 = scalar_lea.hbm %s610_s3, 2048 }
 0x305   :  { %p458_p13 = scmp.ne.s32.totalorder %s610_s3, %s457_s11  ;;  %p461_p0 = scmp.lt.u32.totalorder %s457_s11, %s610_s3 }
 0x307   :  { %p463_p1 = pnand %p461_p0, %p458_p13 }
 0x309   :  { %466 = shalt.err (!%p463_p1)
}
 0x30a   :  { %374 = dma.vmem_to_hbm [thread:$0]  %s369_s7, 2048, %s610_s3, [#allocation4], %s472_s22, %s472_s22, %s473_s23  }
 0x30b   :  { %469 = dma.done.wait [#allocation4], 2048  }
 0x30c   :  { %470 = vsyncadd [#allocation4], 4294965248 }
 0x30d   :  { %378 = vsyncpa [#allocation3], 1 }
 0x30e   :  { %379 = vsyncpa [#allocation4], 1 }

</bundles_post_ra>
